<compile_context>
chip_gen: v7x
topology: tpu7x:2x2x1
jax: 0.10.0
libtpu: 0.0.40
codegen_flags: <defaults>
</compile_context>

<pallas_src>
import math
from functools import partial

import jax
import jax.numpy as jnp
from jax.experimental import pallas as pl
from jax.experimental.pallas import tpu as pltpu


# ---------------------------------------------------------------------------
# RoPE helpers (faithful to the PyTorch code, incl. the precedence quirk in
# precompute_freqs_cis and the repeat_interleave path).
# ---------------------------------------------------------------------------
def _precompute_freqs_cis(dim, end, theta=10000.0):
    # matches torch: 1.0 / (theta ** arange(...) / dim)
    freqs = 1.0 / (theta ** jnp.arange(0, dim, 2, dtype=jnp.float32)[: dim // 2] / dim)
    t = jnp.arange(end, dtype=jnp.float32)
    freqs = jnp.outer(t, freqs)
    return jnp.cos(freqs), jnp.sin(freqs)


def _rope_tables(seq_len, n_heads, head_dim, max_seq_len, scale):
    freqs_cos, freqs_sin = _precompute_freqs_cis(n_heads, max_seq_len)
    pos = jnp.minimum(jnp.arange(seq_len), max_seq_len - 1)
    cos = freqs_cos[pos]                      # (S, n_heads//2)
    sin = freqs_sin[pos]
    half = head_dim // 2
    if half > cos.shape[-1]:
        rf = half // cos.shape[-1]
        cos = jnp.repeat(cos, rf, axis=-1)    # == torch.repeat_interleave
        sin = jnp.repeat(sin, rf, axis=-1)
    # Per-head half-split layout: lanes [0,D/2) are "even" pair elements,
    # lanes [D/2,D) are "odd" pair elements.
    cos_hs = jnp.concatenate([cos, cos], axis=-1)            # (S, D)
    sin_hs = jnp.concatenate([-sin, sin], axis=-1)           # (S, D), signed
    qcos = (cos_hs * scale).astype(jnp.float32)              # 1/sqrt(D) folded in
    qsin = (sin_hs * scale).astype(jnp.float32)
    return qcos, qsin, cos_hs.astype(jnp.float32), sin_hs.astype(jnp.float32)


def _rotate_half(yh, half):
    d = yh.shape[-1]
    if d % 128 == 0:
        # Lane-aligned head dim: single XLU rotate (free-ish VLIW slot).
        return pltpu.roll(yh, shift=half, axis=yh.ndim - 1)
    # Tiny / unaligned head dims (unit-test shapes): generic slice+concat.
    return jnp.concatenate([yh[..., half:], yh[..., :half]], axis=-1)


# ---------------------------------------------------------------------------
# Kernel 1: fused QKV projection + RoPE (writes q, k^T, v to HBM).
# ---------------------------------------------------------------------------
def _qkv_rope_kernel(x_ref, wq_ref, bq_ref, wk_ref, bk_ref, wv_ref, bv_ref,
                     qcos_ref, qsin_ref, kcos_ref, ksin_ref,
                     q_out_ref, kt_out_ref, v_out_ref,
                     *, n_heads, head_dim):
    x = x_ref[0]                                   # (ts, E) compute dtype
    ts = x.shape[0]
    half = head_dim // 2

    def proj(w_ref, b_ref):
        # Full-width GEMM: MXU N/K = E.
        y = jnp.dot(x, w_ref[...], preferred_element_type=jnp.float32)
        return y + b_ref[...]                      # (ts, E) f32

    def to_heads(y):                               # (ts, E) -> (H, ts, D)
        return jnp.transpose(y.reshape(ts, n_heads, head_dim), (1, 0, 2))

    def rope(yh, cos, sin):                        # yh (H, ts, D); cos/sin (ts, D)
        return yh * cos[None] + _rotate_half(yh, half) * sin[None]

    q = rope(to_heads(proj(wq_ref, bq_ref)), qcos_ref[...], qsin_ref[...])
    k = rope(to_heads(proj(wk_ref, bk_ref)), kcos_ref[...], ksin_ref[...])
    v = to_heads(proj(wv_ref, bv_ref))

    q_out_ref[0] = q.astype(q_out_ref.dtype)                        # (H, ts, D)
    # K stored transposed ONCE here -> no per-q-tile per-head transposes later.
    kt_out_ref[0] = jnp.swapaxes(k, 1, 2).astype(kt_out_ref.dtype)  # (H, D, ts)
    v_out_ref[0] = v.astype(v_out_ref.dtype)                        # (H, ts, D)


# ---------------------------------------------------------------------------
# Kernel 2: attention + fused output projection.
# ---------------------------------------------------------------------------
def _attn_out_kernel(q_ref, kt_ref, v_ref, wo_ref, bo_ref, o_ref, o_scr,
                     *, n_heads, head_dim, compute_dtype, approx_recip):
    # q_ref (1,H,tq,D)  kt_ref (1,H,D,S)  v_ref (1,H,S,D)
    # wo_ref (E,E)      bo_ref (1,E)      o_ref (1,tq,E)   o_scr (tq,E)
    for h in range(n_heads):          # static loop -> fully unrolled (LLO sees it)
        q_h = q_ref[0, h]             # (tq, D), RoPE'd, 1/sqrt(D) pre-folded
        s = jnp.dot(q_h, kt_ref[0, h],
                    preferred_element_type=jnp.float32)             # (tq, S)
        s = s - jnp.max(s, axis=-1, keepdims=True)
        # TODO(synk): on v6e/v7x, if the single EUP slot binds, exp can run on
        # bf16 inputs (keep f32 on v5e).
        p = jnp.exp(s)
        denom = jnp.sum(p, axis=-1, keepdims=True)
        p = p * pl.reciprocal(denom, approx=approx_recip)
        o_h = jnp.dot(p.astype(compute_dtype), v_ref[0, h],
                      preferred_element_type=jnp.float32)           # (tq, D)
        # Write this head's slice of the (tq,E) slab (no f32 carry).
        o_scr[:, h * head_dim:(h + 1) * head_dim] = o_h.astype(o_scr.dtype)
    # One full-width out-projection GEMM.
    out = jnp.dot(o_scr[...], wo_ref[...], preferred_element_type=jnp.float32)
    o_ref[0] = (out + bo_ref[...]).astype(o_ref.dtype)


# ---------------------------------------------------------------------------
# Wrapper
# ---------------------------------------------------------------------------
def _pick_tile(n):
    for t in (256, 512, 128):
        if n % t == 0:
            return t
    return n


def _vmem_limit(nbytes):
    # Explicit scoped-VMEM limit sized to the working set (default is only
    # 16 MiB on v5e / 32 MiB on v6e,v7x); clamped to stay valid on all chips.
    return int(min(max(int(nbytes), 32 * 1024 * 1024), 100 * 1024 * 1024))


def self_attn_forward(x, params, *, n_heads, max_seq_len,
                      compute_dtype=jnp.bfloat16):
    B, S, E = x.shape
    assert E % n_heads == 0
    D = E // n_heads
    assert D % 2 == 0, "RoPE needs an even head_dim"
    wq, bq, wk, bk, wv, bv, wo, bo = params

    cdt = jnp.dtype(compute_dtype)
    isz = cdt.itemsize
    approx_recip = cdt != jnp.dtype(jnp.float32)   # exact recip on f32 path

    ts = _pick_tile(S)   # projection sequence tile
    tq = _pick_tile(S)   # attention query tile
    ns, nq = S // ts, S // tq

    # Per-head half-split column permutation of Wq/Wk/bq/bk ([evens|odds]).
    # q and k get the same per-head orthogonal permutation, so q.k^T per head
    # is unchanged and the RoPE pair swap becomes a rotate-half.
    hperm = jnp.concatenate([jnp.arange(0, D, 2), jnp.arange(1, D, 2)])
    wq_p = wq.reshape(E, n_heads, D)[:, :, hperm].reshape(E, E).astype(cdt)
    wk_p = wk.reshape(E, n_heads, D)[:, :, hperm].reshape(E, E).astype(cdt)
    wv_c = wv.astype(cdt)
    wo_c = wo.astype(cdt)
    bq_p = bq.reshape(n_heads, D)[:, hperm].reshape(1, E).astype(jnp.float32)
    bk_p = bk.reshape(n_heads, D)[:, hperm].reshape(1, E).astype(jnp.float32)
    bv_f = bv.astype(jnp.float32)
    bo_f = bo.astype(jnp.float32)

    scale = 1.0 / math.sqrt(D)
    qcos, qsin, kcos, ksin = _rope_tables(S, n_heads, D, max_seq_len, scale)

    x_c = x.astype(cdt)

    # -------------------- Kernel 1: QKV projection + RoPE --------------------
    def const_ps(shape):   # constant-index operand: single-buffer it
        return pl.BlockSpec(shape, lambda b, s: (0, 0),
                            pipeline_mode=pl.Buffered(1))

    proj_cost = pl.CostEstimate(
        flops=int(2 * 3 * B * S * E * E),
        transcendentals=0,
        bytes_accessed=int(B * S * E * isz + 3 * E * E * isz + 3 * B * S * E * isz))
    proj_vmem = _vmem_limit(
        2 * (3 * E * E * isz + 3 * E * 4          # weights/biases (single-buffered)
             + 2 * ts * E * isz                   # x tile (double-buffered)
             + 2 * 4 * ts * D * 4                 # RoPE tables
             + 2 * 3 * n_heads * ts * D * isz     # outputs
             + 8 * ts * E * 4))                   # f32 intermediates

    q_r, kt_r, v_r = pl.pallas_call(
        partial(_qkv_rope_kernel, n_heads=n_heads, head_dim=D),
        out_shape=(
            jax.ShapeDtypeStruct((B, n_heads, S, D), cdt),   # q  (RoPE'd, scaled)
            jax.ShapeDtypeStruct((B, n_heads, D, S), cdt),   # k^T (RoPE'd)
            jax.ShapeDtypeStruct((B, n_heads, S, D), cdt),   # v
        ),
        grid_spec=pltpu.PrefetchScalarGridSpec(
            num_scalar_prefetch=0,
            grid=(B, ns),
            in_specs=[
                pl.BlockSpec((1, ts, E), lambda b, s: (b, s, 0)),   # x (once)
                const_ps((E, E)), const_ps((1, E)),                 # Wq, bq
                const_ps((E, E)), const_ps((1, E)),                 # Wk, bk
                const_ps((E, E)), const_ps((1, E)),                 # Wv, bv
                pl.BlockSpec((ts, D), lambda b, s: (s, 0)),         # q cos (scaled)
                pl.BlockSpec((ts, D), lambda b, s: (s, 0)),         # q sin (scaled)
                pl.BlockSpec((ts, D), lambda b, s: (s, 0)),         # k cos
                pl.BlockSpec((ts, D), lambda b, s: (s, 0)),         # k sin
            ],
            out_specs=(
                pl.BlockSpec((1, n_heads, ts, D), lambda b, s: (b, 0, s, 0)),
                pl.BlockSpec((1, n_heads, D, ts), lambda b, s: (b, 0, 0, s)),
                pl.BlockSpec((1, n_heads, ts, D), lambda b, s: (b, 0, s, 0)),
            ),
        ),
        compiler_params=pltpu.CompilerParams(
            dimension_semantics=("parallel", "parallel"),
            vmem_limit_bytes=proj_vmem),
        cost_estimate=proj_cost,
    )(x_c, wq_p, bq_p, wk_p, bk_p, wv_c, bv_f, qcos, qsin, kcos, ksin)

    # ---------------- Kernel 2: attention + output projection ----------------
    def const_at(shape):
        return pl.BlockSpec(shape, lambda b, q: (0, 0),
                            pipeline_mode=pl.Buffered(1))

    attn_cost = pl.CostEstimate(
        flops=int(4 * B * n_heads * S * S * D + 2 * B * S * E * E),
        transcendentals=int(B * n_heads * S * S),
        bytes_accessed=int(3 * B * S * E * isz + E * E * isz + B * S * E * 4))
    attn_vmem = _vmem_limit(
        2 * (2 * 2 * n_heads * S * D * isz        # k^T + v (double-buffered)
             + 2 * n_heads * tq * D * isz         # q tile
             + 2 * tq * E * 4                     # output tile (f32)
             + E * E * isz + E * 4                # Wo (single-buffered) + bo
             + tq * E * isz                       # per-head output slab
             + 4 * tq * S * 4))                   # f32 score intermediates

    out = pl.pallas_call(
        partial(_attn_out_kernel, n_heads=n_heads, head_dim=D,
                compute_dtype=cdt, approx_recip=approx_recip),
        out_shape=jax.ShapeDtypeStruct((B, S, E), x.dtype),
        grid_spec=pltpu.PrefetchScalarGridSpec(
            num_scalar_prefetch=0,
            grid=(B, nq),
            in_specs=[
                pl.BlockSpec((1, n_heads, tq, D), lambda b, q: (b, 0, q, 0)),
                pl.BlockSpec((1, n_heads, D, S), lambda b, q: (b, 0, 0, 0)),
                pl.BlockSpec((1, n_heads, S, D), lambda b, q: (b, 0, 0, 0)),
                const_at((E, E)),                                   # Wo
                const_at((1, E)),                                   # bo
            ],
            out_specs=pl.BlockSpec((1, tq, E), lambda b, q: (b, q, 0)),
            scratch_shapes=[pltpu.VMEM((tq, E), cdt)],
        ),
        compiler_params=pltpu.CompilerParams(
            # No cross-grid-step carry anymore: both axes megacore-parallel.
            dimension_semantics=("parallel", "parallel"),
            vmem_limit_bytes=attn_vmem),
        cost_estimate=attn_cost,
    )(q_r, kt_r, v_r, wo_c, bo_f)
    return out


# ---------------------------------------------------------------------------
# Pure-JAX f32 reference (mirrors the PyTorch forward) for correctness check
# ---------------------------------------------------------------------------
def _apply_rope_ref(x, freqs_cos, freqs_sin, position_ids):
    max_pos = freqs_cos.shape[0] - 1
    position_ids = jnp.minimum(position_ids, max_pos)
    cos = freqs_cos[position_ids][:, None]          # (B, 1, S, dim//2)
    sin = freqs_sin[position_ids][:, None]
    xr = x.reshape(*x.shape[:-1], -1, 2)
    x1, x2 = xr[..., 0], xr[..., 1]
    if x1.shape[-1] > cos.shape[-1]:
        rf = x1.shape[-1] // cos.shape[-1]
        cos = jnp.repeat(cos, rf, axis=-1)
        sin = jnp.repeat(sin, rf, axis=-1)
    out = jnp.stack([x1 * cos - x2 * sin, x1 * sin + x2 * cos], axis=-1)
    return out.reshape(x.shape)


def _reference_forward(x, params, *, n_heads, max_seq_len):
    B, S, E = x.shape
    D = E // n_heads
    wq, bq, wk, bk, wv, bv, wo, bo = params
    freqs_cos, freqs_sin = _precompute_freqs_cis(n_heads, max_seq_len)
    position_ids = jnp.minimum(
        jnp.broadcast_to(jnp.arange(S)[None, :], (B, S)), max_seq_len - 1)

    q = x @ wq + bq[0]
    k = x @ wk + bk[0]
    v = x @ wv + bv[0]
    q = q.reshape(B, S, n_heads, D).transpose(0, 2, 1, 3)
    k = k.reshape(B, S, n_heads, D).transpose(0, 2, 1, 3)
    v = v.reshape(B, S, n_heads, D).transpose(0, 2, 1, 3)
    q = _apply_rope_ref(q, freqs_cos, freqs_sin, position_ids)
    k = _apply_rope_ref(k, freqs_cos, freqs_sin, position_ids)

    scores = jnp.einsum("bhqd,bhkd->bhqk", q, k) / math.sqrt(D)
    attn = jax.nn.softmax(scores, axis=-1)
    out = jnp.einsum("bhqk,bhkd->bhqd", attn, v)
    out = out.transpose(0, 2, 1, 3).reshape(B, S, E)
    return out @ wo + bo[0]


# ---------------------------------------------------------------------------
if __name__ == "__main__":
    B, S, E, H = 2, 8, 32, 4
    MAX_SEQ_LEN = 16

    key = jax.random.PRNGKey(0)
    keys = jax.random.split(key, 10)
    bound = 1.0 / math.sqrt(E)

    def init_w(k):
        return jax.random.uniform(k, (E, E), jnp.float32, -bound, bound)

    def init_b(k):
        return jax.random.uniform(k, (1, E), jnp.float32, -bound, bound)

    params = (init_w(keys[0]), init_b(keys[1]),   # query
              init_w(keys[2]), init_b(keys[3]),   # key
              init_w(keys[4]), init_b(keys[5]),   # value
              init_w(keys[6]), init_b(keys[7]))   # fc_out

    x = jax.random.normal(keys[8], (B, S, E), jnp.float32)

    ref = jax.block_until_ready(
        _reference_forward(x, params, n_heads=H, max_seq_len=MAX_SEQ_LEN))

    # f32 compute path (numerics check; exact softmax reciprocal)
    out_f32 = jax.block_until_ready(
        self_attn_forward(x, params, n_heads=H, max_seq_len=MAX_SEQ_LEN,
                          compute_dtype=jnp.float32))
    assert out_f32.shape == (B, S, E) and out_f32.dtype == jnp.float32
    err32 = float(jnp.max(jnp.abs(out_f32 - ref)))
    assert jnp.allclose(out_f32, ref, atol=1e-2, rtol=1e-2), (
        f"f32 path max abs err {err32}")

    # bf16 MXU path (default / fast) — looser tolerance for bf16 operands
    out_bf16 = jax.block_until_ready(
        self_attn_forward(x, params, n_heads=H, max_seq_len=MAX_SEQ_LEN,
                          compute_dtype=jnp.bfloat16))
    assert out_bf16.shape == (B, S, E) and out_bf16.dtype == jnp.float32
    err16 = float(jnp.max(jnp.abs(out_bf16 - ref)))
    assert jnp.allclose(out_bf16, ref, atol=5e-2, rtol=5e-2), (
        f"bf16 path max abs err {err16}")

    print("KERNEL_OK")
</pallas_src>

<mosaic_0001>
module attributes {stable_mosaic.version = 11 : i64} {
  func.func @_qkv_rope_kernel(%arg0: i32, %arg1: i32, %arg2: memref<1x8x32xf32, #tpu.memory_space<vmem>>, %arg3: memref<32x32xf32, #tpu.memory_space<vmem>>, %arg4: memref<1x32xf32, #tpu.memory_space<vmem>>, %arg5: memref<32x32xf32, #tpu.memory_space<vmem>>, %arg6: memref<1x32xf32, #tpu.memory_space<vmem>>, %arg7: memref<32x32xf32, #tpu.memory_space<vmem>>, %arg8: memref<1x32xf32, #tpu.memory_space<vmem>>, %arg9: memref<8x8xf32, #tpu.memory_space<vmem>>, %arg10: memref<8x8xf32, #tpu.memory_space<vmem>>, %arg11: memref<8x8xf32, #tpu.memory_space<vmem>>, %arg12: memref<8x8xf32, #tpu.memory_space<vmem>>, %arg13: memref<1x4x8x8xf32, #tpu.memory_space<vmem>>, %arg14: memref<1x4x8x8xf32, #tpu.memory_space<vmem>>, %arg15: memref<1x4x8x8xf32, #tpu.memory_space<vmem>>) attributes {dimension_semantics = [#tpu.dimension_semantics<parallel>, #tpu.dimension_semantics<parallel>], iteration_bounds = array<i64: 2, 1>, scalar_prefetch = 0 : i64, scratch_operands = 0 : i64, tpu.core_type = #tpu.core_type<tc>, window_params = [{transform_indices = @transform_0, window_bounds = array<i64: 1, 8, 32>}, {pipeline_mode = #tpu.pipeline_mode<synchronous>, transform_indices = @transform_1, window_bounds = array<i64: 32, 32>}, {pipeline_mode = #tpu.pipeline_mode<synchronous>, transform_indices = @transform_2, window_bounds = array<i64: 1, 32>}, {pipeline_mode = #tpu.pipeline_mode<synchronous>, transform_indices = @transform_3, window_bounds = array<i64: 32, 32>}, {pipeline_mode = #tpu.pipeline_mode<synchronous>, transform_indices = @transform_4, window_bounds = array<i64: 1, 32>}, {pipeline_mode = #tpu.pipeline_mode<synchronous>, transform_indices = @transform_5, window_bounds = array<i64: 32, 32>}, {pipeline_mode = #tpu.pipeline_mode<synchronous>, transform_indices = @transform_6, window_bounds = array<i64: 1, 32>}, {transform_indices = @transform_7, window_bounds = array<i64: 8, 8>}, {transform_indices = @transform_8, window_bounds = array<i64: 8, 8>}, {transform_indices = @transform_9, window_bounds = array<i64: 8, 8>}, {transform_indices = @transform_10, window_bounds = array<i64: 8, 8>}, {transform_indices = @transform_11, window_bounds = array<i64: 1, 4, 8, 8>}, {transform_indices = @transform_12, window_bounds = array<i64: 1, 4, 8, 8>}, {transform_indices = @transform_13, window_bounds = array<i64: 1, 4, 8, 8>}]} {
    %c0 = arith.constant 0 : index
    %c0_0 = arith.constant 0 : index
    %c0_1 = arith.constant 0 : index
    %0 = vector.load %arg2[%c0, %c0_0, %c0_1] : memref<1x8x32xf32, #tpu.memory_space<vmem>>, vector<1x8x32xf32>
    %1 = vector.shape_cast %0 : vector<1x8x32xf32> to vector<8x32xf32>
    %c0_2 = arith.constant 0 : index
    %c0_3 = arith.constant 0 : index
    %2 = vector.load %arg3[%c0_2, %c0_3] : memref<32x32xf32, #tpu.memory_space<vmem>>, vector<32x32xf32>
    %cst = arith.constant dense<0.000000e+00> : vector<8x32xf32>
    %3 = tpu.matmul %1, %2, %cst {dimension_numbers = #tpu.dot_dimension_numbers<[1], [0], [0], [1], [0, 0, 1, 1], [], []>} : vector<8x32xf32>, vector<32x32xf32>, vector<8x32xf32> -> vector<8x32xf32>
    %c0_4 = arith.constant 0 : index
    %c0_5 = arith.constant 0 : index
    %4 = vector.load %arg4[%c0_4, %c0_5] : memref<1x32xf32, #tpu.memory_space<vmem>>, vector<1x32xf32>
    %5 = vector.broadcast %4 : vector<1x32xf32> to vector<8x32xf32>
    %6 = arith.addf %3, %5 : vector<8x32xf32>
    %7 = vector.shape_cast %6 : vector<8x32xf32> to vector<8x4x8xf32>
    %8 = tpu.transpose %7, [1, 0, 2] : vector<8x4x8xf32> -> vector<4x8x8xf32>
    %c0_6 = arith.constant 0 : index
    %c0_7 = arith.constant 0 : index
    %9 = vector.load %arg9[%c0_6, %c0_7] : memref<8x8xf32, #tpu.memory_space<vmem>>, vector<8x8xf32>
    %c0_8 = arith.constant 0 : index
    %c0_9 = arith.constant 0 : index
    %10 = vector.load %arg10[%c0_8, %c0_9] : memref<8x8xf32, #tpu.memory_space<vmem>>, vector<8x8xf32>
    %11 = vector.shape_cast %9 : vector<8x8xf32> to vector<1x8x8xf32>
    %12 = vector.broadcast %11 : vector<1x8x8xf32> to vector<4x8x8xf32>
    %13 = arith.mulf %8, %12 : vector<4x8x8xf32>
    %14 = vector.extract_strided_slice %8 {offsets = [0, 0, 4], sizes = [4, 8, 4], strides = [1, 1, 1]} : vector<4x8x8xf32> to vector<4x8x4xf32>
    %15 = vector.extract_strided_slice %8 {offsets = [0, 0, 0], sizes = [4, 8, 4], strides = [1, 1, 1]} : vector<4x8x8xf32> to vector<4x8x4xf32>
    %16 = tpu.concatenate %14, %15 in 2 : vector<4x8x4xf32>, vector<4x8x4xf32> -> vector<4x8x8xf32>
    %17 = vector.shape_cast %10 : vector<8x8xf32> to vector<1x8x8xf32>
    %18 = vector.broadcast %17 : vector<1x8x8xf32> to vector<4x8x8xf32>
    %19 = arith.mulf %16, %18 : vector<4x8x8xf32>
    %20 = arith.addf %13, %19 : vector<4x8x8xf32>
    %c0_10 = arith.constant 0 : index
    %c0_11 = arith.constant 0 : index
    %21 = vector.load %arg5[%c0_10, %c0_11] : memref<32x32xf32, #tpu.memory_space<vmem>>, vector<32x32xf32>
    %cst_12 = arith.constant dense<0.000000e+00> : vector<8x32xf32>
    %22 = tpu.matmul %1, %21, %cst_12 {dimension_numbers = #tpu.dot_dimension_numbers<[1], [0], [0], [1], [0, 0, 1, 1], [], []>} : vector<8x32xf32>, vector<32x32xf32>, vector<8x32xf32> -> vector<8x32xf32>
    %c0_13 = arith.constant 0 : index
    %c0_14 = arith.constant 0 : index
    %23 = vector.load %arg6[%c0_13, %c0_14] : memref<1x32xf32, #tpu.memory_space<vmem>>, vector<1x32xf32>
    %24 = vector.broadcast %23 : vector<1x32xf32> to vector<8x32xf32>
    %25 = arith.addf %22, %24 : vector<8x32xf32>
    %26 = vector.shape_cast %25 : vector<8x32xf32> to vector<8x4x8xf32>
    %27 = tpu.transpose %26, [1, 0, 2] : vector<8x4x8xf32> -> vector<4x8x8xf32>
    %c0_15 = arith.constant 0 : index
    %c0_16 = arith.constant 0 : index
    %28 = vector.load %arg11[%c0_15, %c0_16] : memref<8x8xf32, #tpu.memory_space<vmem>>, vector<8x8xf32>
    %c0_17 = arith.constant 0 : index
    %c0_18 = arith.constant 0 : index
    %29 = vector.load %arg12[%c0_17, %c0_18] : memref<8x8xf32, #tpu.memory_space<vmem>>, vector<8x8xf32>
    %30 = vector.shape_cast %28 : vector<8x8xf32> to vector<1x8x8xf32>
    %31 = vector.broadcast %30 : vector<1x8x8xf32> to vector<4x8x8xf32>
    %32 = arith.mulf %27, %31 : vector<4x8x8xf32>
    %33 = vector.extract_strided_slice %27 {offsets = [0, 0, 4], sizes = [4, 8, 4], strides = [1, 1, 1]} : vector<4x8x8xf32> to vector<4x8x4xf32>
    %34 = vector.extract_strided_slice %27 {offsets = [0, 0, 0], sizes = [4, 8, 4], strides = [1, 1, 1]} : vector<4x8x8xf32> to vector<4x8x4xf32>
    %35 = tpu.concatenate %33, %34 in 2 : vector<4x8x4xf32>, vector<4x8x4xf32> -> vector<4x8x8xf32>
    %36 = vector.shape_cast %29 : vector<8x8xf32> to vector<1x8x8xf32>
    %37 = vector.broadcast %36 : vector<1x8x8xf32> to vector<4x8x8xf32>
    %38 = arith.mulf %35, %37 : vector<4x8x8xf32>
    %39 = arith.addf %32, %38 : vector<4x8x8xf32>
    %c0_19 = arith.constant 0 : index
    %c0_20 = arith.constant 0 : index
    %40 = vector.load %arg7[%c0_19, %c0_20] : memref<32x32xf32, #tpu.memory_space<vmem>>, vector<32x32xf32>
    %cst_21 = arith.constant dense<0.000000e+00> : vector<8x32xf32>
    %41 = tpu.matmul %1, %40, %cst_21 {dimension_numbers = #tpu.dot_dimension_numbers<[1], [0], [0], [1], [0, 0, 1, 1], [], []>} : vector<8x32xf32>, vector<32x32xf32>, vector<8x32xf32> -> vector<8x32xf32>
    %c0_22 = arith.constant 0 : index
    %c0_23 = arith.constant 0 : index
    %42 = vector.load %arg8[%c0_22, %c0_23] : memref<1x32xf32, #tpu.memory_space<vmem>>, vector<1x32xf32>
    %43 = vector.broadcast %42 : vector<1x32xf32> to vector<8x32xf32>
    %44 = arith.addf %41, %43 : vector<8x32xf32>
    %45 = vector.shape_cast %44 : vector<8x32xf32> to vector<8x4x8xf32>
    %46 = tpu.transpose %45, [1, 0, 2] : vector<8x4x8xf32> -> vector<4x8x8xf32>
    %c0_24 = arith.constant 0 : index
    %c0_25 = arith.constant 0 : index
    %c0_26 = arith.constant 0 : index
    %c0_27 = arith.constant 0 : index
    %47 = vector.load %arg13[%c0_24, %c0_25, %c0_26, %c0_27] : memref<1x4x8x8xf32, #tpu.memory_space<vmem>>, vector<1x4x8x8xf32>
    %48 = vector.shape_cast %47 : vector<1x4x8x8xf32> to vector<4x8x8xf32>
    %49 = vector.shape_cast %20 : vector<4x8x8xf32> to vector<1x4x8x8xf32>
    tpu.vector_store %arg13[%c0_24, %c0_25, %c0_26, %c0_27], %49 {strides = array<i32>} : memref<1x4x8x8xf32, #tpu.memory_space<vmem>>, vector<1x4x8x8xf32>,
    %50 = tpu.transpose %39, [0, 2, 1] : vector<4x8x8xf32> -> vector<4x8x8xf32>
    %c0_28 = arith.constant 0 : index
    %c0_29 = arith.constant 0 : index
    %c0_30 = arith.constant 0 : index
    %c0_31 = arith.constant 0 : index
    %51 = vector.load %arg14[%c0_28, %c0_29, %c0_30, %c0_31] : memref<1x4x8x8xf32, #tpu.memory_space<vmem>>, vector<1x4x8x8xf32>
    %52 = vector.shape_cast %51 : vector<1x4x8x8xf32> to vector<4x8x8xf32>
    %53 = vector.shape_cast %50 : vector<4x8x8xf32> to vector<1x4x8x8xf32>
    tpu.vector_store %arg14[%c0_28, %c0_29, %c0_30, %c0_31], %53 {strides = array<i32>} : memref<1x4x8x8xf32, #tpu.memory_space<vmem>>, vector<1x4x8x8xf32>,
    %c0_32 = arith.constant 0 : index
    %c0_33 = arith.constant 0 : index
    %c0_34 = arith.constant 0 : index
    %c0_35 = arith.constant 0 : index
    %54 = vector.load %arg15[%c0_32, %c0_33, %c0_34, %c0_35] : memref<1x4x8x8xf32, #tpu.memory_space<vmem>>, vector<1x4x8x8xf32>
    %55 = vector.shape_cast %54 : vector<1x4x8x8xf32> to vector<4x8x8xf32>
    %56 = vector.shape_cast %46 : vector<4x8x8xf32> to vector<1x4x8x8xf32>
    tpu.vector_store %arg15[%c0_32, %c0_33, %c0_34, %c0_35], %56 {strides = array<i32>} : memref<1x4x8x8xf32, #tpu.memory_space<vmem>>, vector<1x4x8x8xf32>,
    return
  }
  func.func @transform_0(%arg0: i32, %arg1: i32) -> (i32, i32, i32) {
    %c0_i32 = arith.constant 0 : i32
    %c0_i32_0 = arith.constant 0 : i32
    return %arg0, %arg1, %c0_i32 : i32, i32, i32
  }
  func.func @transform_1(%arg0: i32, %arg1: i32) -> (i32, i32) {
    %c0_i32 = arith.constant 0 : i32
    %c0_i32_0 = arith.constant 0 : i32
    %c0_i32_1 = arith.constant 0 : i32
    return %c0_i32, %c0_i32_0 : i32, i32
  }
  func.func @transform_2(%arg0: i32, %arg1: i32) -> (i32, i32) {
    %c0_i32 = arith.constant 0 : i32
    %c0_i32_0 = arith.constant 0 : i32
    %c0_i32_1 = arith.constant 0 : i32
    return %c0_i32, %c0_i32_0 : i32, i32
  }
  func.func @transform_3(%arg0: i32, %arg1: i32) -> (i32, i32) {
    %c0_i32 = arith.constant 0 : i32
    %c0_i32_0 = arith.constant 0 : i32
    %c0_i32_1 = arith.constant 0 : i32
    return %c0_i32, %c0_i32_0 : i32, i32
  }
  func.func @transform_4(%arg0: i32, %arg1: i32) -> (i32, i32) {
    %c0_i32 = arith.constant 0 : i32
    %c0_i32_0 = arith.constant 0 : i32
    %c0_i32_1 = arith.constant 0 : i32
    return %c0_i32, %c0_i32_0 : i32, i32
  }
  func.func @transform_5(%arg0: i32, %arg1: i32) -> (i32, i32) {
    %c0_i32 = arith.constant 0 : i32
    %c0_i32_0 = arith.constant 0 : i32
    %c0_i32_1 = arith.constant 0 : i32
    return %c0_i32, %c0_i32_0 : i32, i32
  }
  func.func @transform_6(%arg0: i32, %arg1: i32) -> (i32, i32) {
    %c0_i32 = arith.constant 0 : i32
    %c0_i32_0 = arith.constant 0 : i32
    %c0_i32_1 = arith.constant 0 : i32
    return %c0_i32, %c0_i32_0 : i32, i32
  }
  func.func @transform_7(%arg0: i32, %arg1: i32) -> (i32, i32) {
    %c0_i32 = arith.constant 0 : i32
    %c0_i32_0 = arith.constant 0 : i32
    return %arg1, %c0_i32 : i32, i32
  }
  func.func @transform_8(%arg0: i32, %arg1: i32) -> (i32, i32) {
    %c0_i32 = arith.constant 0 : i32
    %c0_i32_0 = arith.constant 0 : i32
    return %arg1, %c0_i32 : i32, i32
  }
  func.func @transform_9(%arg0: i32, %arg1: i32) -> (i32, i32) {
    %c0_i32 = arith.constant 0 : i32
    %c0_i32_0 = arith.constant 0 : i32
    return %arg1, %c0_i32 : i32, i32
  }
  func.func @transform_10(%arg0: i32, %arg1: i32) -> (i32, i32) {
    %c0_i32 = arith.constant 0 : i32
    %c0_i32_0 = arith.constant 0 : i32
    return %arg1, %c0_i32 : i32, i32
  }
  func.func @transform_11(%arg0: i32, %arg1: i32) -> (i32, i32, i32, i32) {
    %c0_i32 = arith.constant 0 : i32
    %c0_i32_0 = arith.constant 0 : i32
    %c0_i32_1 = arith.constant 0 : i32
    return %arg0, %c0_i32, %arg1, %c0_i32_0 : i32, i32, i32, i32
  }
  func.func @transform_12(%arg0: i32, %arg1: i32) -> (i32, i32, i32, i32) {
    %c0_i32 = arith.constant 0 : i32
    %c0_i32_0 = arith.constant 0 : i32
    %c0_i32_1 = arith.constant 0 : i32
    return %arg0, %c0_i32, %c0_i32_0, %arg1 : i32, i32, i32, i32
  }
  func.func @transform_13(%arg0: i32, %arg1: i32) -> (i32, i32, i32, i32) {
    %c0_i32 = arith.constant 0 : i32
    %c0_i32_0 = arith.constant 0 : i32
    %c0_i32_1 = arith.constant 0 : i32
    return %arg0, %c0_i32, %arg1, %c0_i32_0 : i32, i32, i32, i32
  }
}

</mosaic_0001>

<bundles_post_ra>
// kernel: tpu_custom_call.1
= control target key start
LH: loop header
LB: loop body
LE: loop exit
PB: predicated region body
PF: predicated region fallthrough
CT: control target
= control target key end

     0   :  { %s3015_s0 = inlined_call_operand.hbm [shape: f32[2,8,32], index: 0, kind: input, shape index: {}]   ;;  %s3016_s1 = inlined_call_operand.hbm [shape: f32[32,32], index: 1, kind: input, shape index: {}]   ;;  %s3017_s2 = inlined_call_operand.vmem [shape: f32[1,32], index: 2, kind: input, shape index: {}]   ;;  %s3018_s3 = inlined_call_operand.hbm [shape: f32[32,32], index: 3, kind: input, shape index: {}]   ;;  %s3019_s4 = inlined_call_operand.vmem [shape: f32[1,32], index: 4, kind: input, shape index: {}]   ;;  %s3020_s5 = inlined_call_operand.hbm [shape: f32[32,32], index: 5, kind: input, shape index: {}]   ;;  %s3021_s6 = inlined_call_operand.hbm [shape: f32[1,32], index: 6, kind: input, shape index: {}]   ;;  %s3022_s7 = inlined_call_operand.vmem [shape: f32[8,8], index: 7, kind: input, shape index: {}]   ;;  %s3023_s8 = inlined_call_operand.vmem [shape: f32[8,8], index: 8, kind: input, shape index: {}]   ;;  %s3024_s9 = inlined_call_operand.vmem [shape: f32[8,8], index: 9, kind: input, shape index: {}]   ;;  %s3025_s10 = inlined_call_operand.vmem [shape: f32[8,8], index: 10, kind: input, shape index: {}]   ;;  %s3026_s11 = inlined_call_operand.hbm [shape: f32[2,4,8,8], index: 11, kind: output, shape index: {0}]   ;;  %s3027_s12 = inlined_call_operand.hbm [shape: f32[2,4,8,8], index: 12, kind: output, shape index: {1}]   ;;  %s3028_s13 = inlined_call_operand.hbm [shape: f32[2,4,8,8], index: 13, kind: output, shape index: {2}]  }
   0x1   :  { %3040 = sst [smem:[#allocation21_spill]] %s3015_s0 }
   0x2   :  { %3041 = sst [smem:[#allocation22_spill]] %s3016_s1 }
   0x3   :  { %3042 = sst [smem:[#allocation23_spill]] %s3017_s2 }
   0x4   :  { %3043 = sst [smem:[#allocation24_spill]] %s3022_s7 }
   0x5   :  { %3044 = sst [smem:[#allocation25_spill]] %s3023_s8 }
   0x6   :  { %3045 = sst [smem:[#allocation26_spill]] %s3024_s9 }
   0x7   :  { %3046 = sst [smem:[#allocation27_spill]] %s3026_s11 }
   0x8   :  { %3047 = sst [smem:[#allocation28_spill]] %s3027_s12 }
   0x9   :  { %3048 = sst [smem:[#allocation29_spill]] %s3028_s13 }
   0xa   :  { %19 = vsyncpa [#allocation3], 0 }
   0xb   :  { %21 = vsyncpa [#allocation3 + $0x1], 0 }
   0xc   :  { %22 = vsyncpa [#allocation6], 0 }
   0xd   :  { %23 = vsyncpa [#allocation9], 0 }
   0xe   :  { %24 = vsyncpa [#allocation4], 0 }
   0xf   :  { %26 = vsyncpa [#allocation4 + $0x1], 0 }
  0x10   :  { %27 = vsyncpa [#allocation13], 0 }
  0x11   :  { %29 = vsyncpa [#allocation13 + $0x1], 0  ;;  %s2473_s25 = smov 0   ;;  %s2475_s26 = smov 0  }
  0x12   :  { %s2477_s27 = smov 0   ;;  %s2479_s28 = smov 0  }
  0x13   :  { %s2481_s29 = smov 0   ;;  %s2483_s30 = smov 0  }
  0x14 LB: > { %3049 = sst [smem:[#allocation20_spill]] %s2371_s28  ;;  %s2504_s14 = sadd.s32 4294967295, %s2379_s30   ;;  %s2379_s30 = sphi %s2483_s30, %s35_s30   ;;  %s2375_s29 = sphi %s2481_s29, %s3085_s29   ;;  %s2371_s28 = sphi %s2479_s28, %s3084_s28   ;;  %s2367_s27 = sphi %s2477_s27, %s3083_s27   ;;  %s2363_s26 = sphi %s2475_s26, %s3082_s26   ;;  %s2359_s25 = sphi %s2473_s25, %s3081_s25  }
  0x15   : > { %p1847_p0 = scmp.ge.s32.totalorder %s2379_s30, 1  ;;  %p3032_p1 = scmp.eq.s32.totalorder %s2504_s14, 0 }
  0x16   : > { %p394_p2 = scmp.lt.s32.totalorder %s2379_s30, 3  ;;  %s2381_s16 = smov [#allocation5]  }
  0x17   : > { %s406_s17 = sshll.u32 %s2381_s16, 4  ;;  %s2382_s19 = smov [#allocation8]   ;;  %s2513_s17 = int_to_ptr.vmem [resolvable:$true] %s406_s17 }
  0x18   : > { %p2509_p3 = pnand %p1847_p0, %p394_p2  ;;  %s438_s20 = sshll.u32 %s2382_s19, 4  ;;  %s2524_s20 = int_to_ptr.vmem [resolvable:$true] %s438_s20 }
  0x19   : > { %s2383_s21 = smov [#allocation7]   ;;  %s3052_s1 = sld [smem:[#allocation22_spill]] }
  0x1a   : > { %s3050_s15 = scalar_select %p2509_p3, 1, 0 }
  0x1b   : > { %p1984_p4 = pneg %p2509_p3  ;;  %s2526_s22 = sshll.u32 %s2383_s21, 4  ;;  %s423_s22 = int_to_ptr.vmem [resolvable:$true] %s2526_s22 }
  0x1d   : > { %p2520_p6 = pnand %p1984_p4, %p3032_p1 }
  0x1f   : > { %s2087_s16 = scalar_lea.hbm %s3052_s1, 512  ;;  %p2536_p8 = pneg %p2520_p6 }
  0x20   : > { %p2088_p7 = scmp.ne.s32.totalorder %s3052_s1, %s2087_s16  ;;  %p2094_p11 = scmp.lt.u32.totalorder %s2087_s16, %s3052_s1 }
  0x22   : > { %p2090_p9 = pnand %p2536_p8, %p2088_p7 }
  0x24   : > { %p2091_p10 = pneg %p2090_p9 }
  0x26   : > { %p2096_p12 = pnand %p2094_p11, %p2091_p10 }
  0x28   : > { %2099 = shalt.err (!%p2096_p12)
}
  0x29   : > { %s2100_s12 = scalar_lea.vmem %s2513_s17, 512  ;;  %p2108_p4 = scmp.lt.s32.totalorder %s2513_s17, %s2513_s17 }
  0x2a   : > { %p2101_p13 = scmp.ne.s32.totalorder %s2513_s17, %s2100_s12  ;;  %p2109_p5 = scmp.lt.s32.totalorder %s2100_s12, %s2100_s12 }
  0x2c   : > { %p2103_p0 = pnand %p2101_p13, %p2536_p8  ;;  %p2110_p7 = por %p2109_p5, %p2108_p4 }
  0x2e   : > { %p2104_p2 = pneg %p2103_p0 }
  0x30   : > { %p2111_p9 = pnand %p2110_p7, %p2104_p2 }
  0x32   : > { %2114 = shalt.err (!%p2111_p9)
}
  0x33   : > { %s2384_s13 = smov 128   ;;  %s2385_s23 = smov 8  }
  0x34   : > { %1987 = dma.hbm_to_vmem [thread:$0]  (!%p2520_p6), %s3052_s1, 512, %s2513_s17, [#allocation6], %s2384_s13, %s2384_s13, %s2385_s23  }
  0x35   : > { %s2115_s12 = scalar_lea.hbm %s3020_s5, 512 }
  0x36   : > { %p2116_p5 = scmp.ne.s32.totalorder %s3020_s5, %s2115_s12  ;;  %p2122_p12 = scmp.lt.u32.totalorder %s2115_s12, %s3020_s5 }
  0x38   : > { %p2118_p10 = pnand %p2116_p5, %p2536_p8 }
  0x3a   : > { %p2119_p11 = pneg %p2118_p10 }
  0x3c   : > { %p2124_p13 = pnand %p2122_p12, %p2119_p11 }
  0x3e   : > { %2127 = shalt.err (!%p2124_p13)
}
  0x3f   : > { %s2128_s17 = scalar_lea.vmem %s2524_s20, 512  ;;  %p2136_p7 = scmp.lt.s32.totalorder %s2524_s20, %s2524_s20 }
  0x40   : > { %p2129_p0 = scmp.ne.s32.totalorder %s2524_s20, %s2128_s17  ;;  %p2137_p9 = scmp.lt.s32.totalorder %s2128_s17, %s2128_s17 }
  0x42   : > { %p2131_p2 = pnand %p2129_p0, %p2536_p8  ;;  %p2138_p5 = por %p2137_p9, %p2136_p7 }
  0x44   : > { %p2132_p4 = pneg %p2131_p2 }
  0x46   : > { %p2139_p10 = pnand %p2138_p5, %p2132_p4 }
  0x48   : > { %2142 = shalt.err (!%p2139_p10)
}
  0x49   : > { %1993 = dma.hbm_to_vmem [thread:$0]  (!%p2520_p6), %s3020_s5, 512, %s2524_s20, [#allocation9], %s2384_s13, %s2384_s13, %s2385_s23  }
  0x4a   : > { %s2143_s24 = scalar_lea.hbm %s3018_s3, 512 }
  0x4b   : > { %p2144_p11 = scmp.ne.s32.totalorder %s3018_s3, %s2143_s24  ;;  %p2150_p0 = scmp.lt.u32.totalorder %s2143_s24, %s3018_s3 }
  0x4d   : > { %p2146_p12 = pnand %p2144_p11, %p2536_p8 }
  0x4f   : > { %p2147_p13 = pneg %p2146_p12 }
  0x51   : > { %p2152_p2 = pnand %p2150_p0, %p2147_p13 }
  0x53   : > { %2155 = shalt.err (!%p2152_p2)
}
  0x54   : > { %s2156_s17 = scalar_lea.vmem %s423_s22, 512  ;;  %p2164_p5 = scmp.lt.s32.totalorder %s423_s22, %s423_s22 }
  0x55   : > { %p2157_p4 = scmp.ne.s32.totalorder %s423_s22, %s2156_s17  ;;  %p2165_p10 = scmp.lt.s32.totalorder %s2156_s17, %s2156_s17 }
  0x57   : > { %p2159_p7 = pnand %p2157_p4, %p2536_p8  ;;  %p2166_p1 = por %p2165_p10, %p2164_p5 }
  0x59   : > { %p2160_p9 = pneg %p2159_p7 }
  0x5b   : > { %p2167_p3 = pnand %p2166_p1, %p2160_p9 }
  0x5d   : > { %2170 = shalt.err (!%p2167_p3)
}
  0x5e   : > { %1990 = dma.hbm_to_vmem [thread:$0]  (!%p2520_p6), %s3018_s3, 512, %s423_s22, [#allocation6], %s2384_s13, %s2384_s13, %s2385_s23  }
  0x5f   : > { %s2386_s8 = smov [#allocation10]   ;;  %s2171_s16 = scalar_lea.hbm %s3021_s6, 16 }
  0x60   : > { %s452_s9 = sshll.u32 %s2386_s8, 4  ;;  %p2172_p1 = scmp.ne.s32.totalorder %s3021_s6, %s2171_s16  ;;  %s453_s9 = int_to_ptr.vmem [resolvable:$true] %s452_s9 }
  0x61   : > { %p2178_p12 = scmp.lt.u32.totalorder %s2171_s16, %s3021_s6 }
  0x62   : > { %p2174_p3 = pnand %p2172_p1, %p2536_p8 }
  0x64   : > { %p2175_p11 = pneg %p2174_p3 }
  0x66   : > { %p2180_p13 = pnand %p2178_p12, %p2175_p11 }
  0x68   : > { %2183 = shalt.err (!%p2180_p13)
}
  0x69   : > { %s2184_s22 = scalar_lea.vmem %s453_s9, 16  ;;  %s2191_s13 = scalar_lea.vmem %s453_s9, 32 }
  0x6a   : > { %p2185_p0 = scmp.ne.s32.totalorder %s453_s9, %s2184_s22  ;;  %p2192_p7 = scmp.lt.s32.totalorder %s453_s9, %s453_s9 }
  0x6b   : > { %p2193_p9 = scmp.lt.s32.totalorder %s2191_s13, %s2184_s22 }
  0x6c   : > { %p2187_p2 = pnand %p2185_p0, %p2536_p8 }
  0x6d   : > { %p2194_p5 = por %p2193_p9, %p2192_p7 }
  0x6e   : > { %p2188_p4 = pneg %p2187_p2 }
  0x70   : > { %p2195_p10 = pnand %p2194_p5, %p2188_p4 }
  0x72   : > { %2198 = shalt.err (!%p2195_p10)
}
  0x73   : > { %1996 = dma.hbm_to_vmem [thread:$0]  (!%p2520_p6), %s3021_s6, 16, %s453_s9, [#allocation9]  }
  0x74   : > { %s3034_s11 = sadd.s32 4294967294, %s2379_s30   ;;  %s47_s7 = sadd.s32 1, %s2375_s29 }
  0x75   : > { %p49_p8 = scmp.ge.s32.totalorder %s47_s7, 2  ;;  %s56_s18 = sadd.s32 1, %s2367_s27 }
  0x76   : > { %p63_p1 = scmp.ne.s32.totalorder %s2367_s27, %s2363_s26  ;;  %p64_p3 = scmp.eq.s32.totalorder %s2379_s30, 0 }
  0x77   : > { %s3087_s7 = smov (%p49_p8, %s47_s7), 0  ;;  %p69_p12 = scmp.ne.s32.totalorder %s2363_s26, %s2359_s25 }
  0x78   : > { %p2634_p11 = por %p64_p3, %p63_p1  ;;  %s51_s9 = ssub.s32 %s2375_s29, %s3087_s7 }
  0x79   : > { %p325_p6 = scmp.eq.s32.totalorder %s2504_s14, 1  ;;  %p54_p13 = scmp.eq.s32.totalorder %s51_s9, 0 }
  0x7a   : > { %p3055_p0 = scmp.eq.s32.totalorder %s2504_s14, 0  ;;  %p331_p7 = scmp.eq.s32.totalorder %s3034_s11, 1 }
  0x7b   : > { %p2649_p4 = por %p325_p6, %p63_p1  ;;  %p2015_p5 = scmp.lt.s32.totalorder %s2379_s30, 2 }
  0x7c   : > { %p2645_p2 = por %p3055_p0, %p69_p12  ;;  %p2658_p9 = por %p331_p7, %p69_p12 }
  0x7d   : > { %s3057_s24 = scalar_select %p2649_p4, 1, 0 }
  0x7e   : > { %s2656_s16 = scalar_select %p54_p13, %s2367_s27, %s56_s18  }
  0x7f   : > { %s3058_s19 = scalar_select %p2658_p9, 1, 0 }
  0x80   : > { %s491_s21 = sand.u32 1, %s2367_s27   ;;  %s1858_s12 = sshll.u32 %s2375_s29, 7 }
  0x81   : > { %s1857_s17 = sshll.u32 %s491_s21, 3  ;;  %s3059_s0 = sld [smem:[#allocation21_spill]] }
  0x82   : > { %s495_s20 = scalar_lea.vmem [#allocation2], %s1857_s17  ;;  %p2672_p10 = pnand %p2015_p5, %p2634_p11 }
  0x83   : > { %s503_s18 = sshll.u32 %s495_s20, 4  ;;  %s492_s11 = scalar_lea.sflag [#allocation3], %s491_s21  ;;  %s2676_s18 = int_to_ptr.vmem [resolvable:$true] %s503_s18 }
  0x84   : > { %p2201_p1 = pneg %p2672_p10 }
  0x87   : > { %s2668_s23 = scalar_lea.hbm %s3059_s0, %s1858_s12  ;;  %s2204_s8 = scalar_lea.hbm %s3059_s0, 256 }
  0x88   : > { %s2199_s1 = scalar_lea.hbm %s2668_s23, 128  ;;  %p2205_p11 = scmp.lt.u32.totalorder %s2668_s23, %s3059_s0 }
  0x89   : > { %p2200_p8 = scmp.ne.s32.totalorder %s2668_s23, %s2199_s1  ;;  %p2206_p6 = scmp.lt.u32.totalorder %s2204_s8, %s2199_s1 }
  0x8a   : > { %p2208_p0 = scmp.lt.u32.totalorder %s2199_s1, %s2668_s23 }
  0x8b   : > { %p2202_p3 = pnand %p2201_p1, %p2200_p8  ;;  %p2207_p13 = por %p2206_p6, %p2205_p11 }
  0x8d   : > { %p2203_p12 = pneg %p2202_p3  ;;  %p2209_p7 = por %p2208_p0, %p2207_p13 }
  0x8f   : > { %p2210_p5 = pnand %p2209_p7, %p2203_p12 }
  0x91   : > { %2213 = shalt.err (!%p2210_p5)
}
  0x92   : > { %s2214_s21 = scalar_lea.vmem %s2676_s18, 128  ;;  %s2387_s20 = smov [#allocation2]  }
  0x93   : > { %p2215_p8 = scmp.ne.s32.totalorder %s2676_s18, %s2214_s21  ;;  %s2219_s12 = sshll.u32 %s2387_s20, 4  ;;  %s2220_s12 = int_to_ptr.vmem [resolvable:$false] %s2219_s12 }
  0x94   : > { %s2221_s17 = scalar_lea.vmem %s2220_s12, 256  ;;  %p2222_p4 = scmp.lt.s32.totalorder %s2676_s18, %s2220_s12 }
  0x95   : > { %p2217_p3 = pnand %p2215_p8, %p2201_p1  ;;  %p2223_p11 = scmp.lt.s32.totalorder %s2221_s17, %s2214_s21 }
  0x97   : > { %p2218_p9 = pneg %p2217_p3  ;;  %p2224_p6 = por %p2223_p11, %p2222_p4 }
  0x99   : > { %p2225_p13 = pnand %p2224_p6, %p2218_p9 }
  0x9b   : > { %2228 = shalt.err (!%p2225_p13)
}
  0x9c   : > { %2000 = dma.hbm_to_vmem [thread:$0]  (!%p2672_p10), %s2668_s23, 128, %s2676_s18, %s492_s11  }
  0x9d   : > { %p3061_p12 = scmp.ne.s32.totalorder %s3050_s15, 0 }
  0x9e   : > { %s2706_s1 = sand.u32 (!%p3061_p12), 1, %s2363_s26  }
  0x9f   : > { %512 = sbr.rel (%p3061_p12) target bundleno = 836 (0x344), region = 64  ;;  %s1860_s8 = sshll.u32 (!%p3061_p12), %s2706_s1, 3 }
  0xa0   : > { %s515_s22 = scalar_lea.sflag (!%p3061_p12), [#allocation3], %s2706_s1  ;;  %s2710_s13 = scalar_lea.vmem (!%p3061_p12), [#allocation2], %s1860_s8 }
  0xa6   : > { %2338 = dma.done.wait (%p2645_p2), %s515_s22, 128  }
  0xa7   : > { %2340 = vsyncadd (%p2645_p2), %s515_s22, 4294967168  ;;  %p3062_p4 = scmp.eq.s32.totalorder %s2504_s14, 0 }
  0xa9   : > { %2342 = dma.done.wait (%p3062_p4), [#allocation6], 1024   ;;  %p3063_p9 = pmov %p3062_p4 }
  0xaa   : > { %p3064_p10 = pmov %p3062_p4 }
  0xab   : > { %2344 = vsyncadd (%p3063_p9), [#allocation6], 4294966272 }
  0xac   : > { %2346 = dma.done.wait (%p3064_p10), [#allocation9], 528   ;;  %p3065_p1 = pmov %p3062_p4 }
  0xad   : > { %v2388_v0 = vmov 0.0|0.0   ;;  %vm2389_vm0 = vmmov 0   ;;  %v2390_v1 = vmov 0.0   ;;  %v898_v2 = vld [vmem:[#allocation7] sm:$0xff]  ;;  %v899_v3 = vld [vmem:[#allocation7 + $0x8] sm:$0xff]  ;;  %v900_v7 = vld [vmem:[#allocation7 + $0x10] sm:$0xff]  ;;  %v720_v33 = vlaneseq }
  0xae   : > { %2348 = vsyncadd (%p3065_p1), [#allocation9], 4294966768  ;;  %1948 = vmatprep.subr.bf16.mxu1 %v2388_v0  ;;  %1942 = vmatprep.subr.bf16.mxu0 %v2388_v0  ;;  %v620_v4 = vld [vmem:[#allocation5] sm:$0xff]  ;;  %v1949_v5 = vpack.c.bf16 %v899_v3, %v898_v2  ;;  %v621_v6 = vld [vmem:[#allocation5 + $0x8] sm:$0xff]  ;;  %vm631_vm1 = vcmask 261120   ;;  %s3066_s2 = sld [smem:[#allocation23_spill]] }
  0xaf   : > { %1928 = vmatprep.mubr.msk.f32.mxu1 %vm2389_vm0, %v2390_v1  ;;  %1917 = vmatprep.mubr.msk.f32.mxu0 %vm2389_vm0, %v2390_v1  ;;  %v901_v8 = vld [vmem:[#allocation7 + $0x18] sm:$0xff]  ;;  %v1943_v9 = vpack.c.bf16 %v621_v6, %v620_v4  ;;  %v622_v10 = vld [vmem:[#allocation5 + $0x10] sm:$0xff]  ;;  %v1171_v14 = vld [vmem:[#allocation8] sm:$0xff]  ;;  %s2391_s18 = smov 104   ;;  %s2392_s9 = smov 120   ;;  %v721_v37 = vshrl.u32 %v720_v33, 7 }
  0xb0   : > { %v623_v11 = vld [vmem:[#allocation5 + $0x18] sm:$0xff]  ;;  %1950 = vmatpush3.bf16.msra.mxu1 %v1949_v5  ;;  %v1952_v12 = vpack.c.bf16 %v901_v8, %v900_v7  ;;  %v1172_v15 = vld [vmem:[#allocation8 + $0x8] sm:$0xff]  ;;  %v1173_v18 = vld [vmem:[#allocation8 + $0x10] sm:$0xff]  ;;  %s2393_s21 = smov 112   ;;  %v2394_v31 = vmov 1983009808  }
  0xb1   : > { %1951 = vmatprep.subr.bf16.mxu1 %v2388_v0  ;;  %1944 = vmatpush3.bf16.msra.mxu0 %v1943_v9  ;;  %v1946_v13 = vpack.c.bf16 %v623_v11, %v622_v10  ;;  %v619_v16 = vld [vmem:[%s2710_s13] sm:$0xff]  ;;  %v1955_v17 = vpack.c.bf16 %v1172_v15, %v1171_v14  ;;  %v718_v32 = vunpack.c.l.s4 %v2394_v31  ;;  %v2395_v34 = vmov 1934713408   ;;  %s2396_s20 = smov 124   ;;  %s2397_s12 = smov 4  }
  0xb2   : > { %1945 = vmatprep.subr.bf16.mxu0 %v2388_v0  ;;  %v1174_v19 = vld [vmem:[#allocation8 + $0x18] sm:$0xff]  ;;  %v1872_v21 = vld [vmem:[%s3019_s4] ss:$0 sm:$0xff]  ;;  %v750_v35 = vunpack.c.l.s4 %v2395_v34  ;;  %vm885_vm2 = vcmask 31744   ;;  %s3067_s15 = sld [smem:[#allocation26_spill]]  ;;  %s3068_s23 = sld [smem:[#allocation24_spill]] }
  0xb3   : > { %v1958_v20 = vpack.c.bf16 %v1174_v19, %v1173_v18  ;;  %v719_v36 = vunpack.c.0.s8 %v718_v32  ;;  %vm1398_vm3 = vcmask 64512   ;;  %s3071_s28 = sld [smem:[#allocation27_spill]]  ;;  %p3073_p0 = scmp.ne.s32.totalorder %s3057_s24, 0 }
  0xb4   : > { %1953 = vmatpush3.bf16.msra.mxu1 %v1952_v12  ;;  %v1868_v23 = vld [vmem:[%s3066_s2] ss:$0 sm:$0xff]  ;;  %v751_v40 = vunpack.c.0.s8 %v750_v35 }
  0xb5   : > { %1947 = vmatpush3.bf16.msra.mxu0 %v1946_v13  ;;  %v2742_v41 = vsub.s32 %v719_v36, %v721_v37 }
  0xb6   : > { %1954 = vmatprep.subr.bf16.mxu0 %v2388_v0  ;;  %v2744_v48 = vsub.s32 %v751_v40, %v721_v37 }
  0xb7   : > { %1929 = vmatmul.mubr.msk.f32.vlgmr.msra.gmra.mrb[0].mxu1 %vm631_vm1, %v619_v16 }
  0xb8   : > { %1918 = vmatmul.mubr.msk.f32.vlgmr.msra.gmra.mrb[0].mxu0 %vm631_vm1, %v619_v16 }
  0xb9   : > { %1956 = vmatpush3.bf16.msra.mxu0 %v1955_v17  ;;  %1939 = vmatprep.mubr.msk.f32.mxu0 %vm2389_vm0, %v2390_v1 }
  0xba   : > { %1957 = vmatprep.subr.bf16.mxu0 %v2388_v0 }
  0xbd   : > { %1959 = vmatpush3.bf16.msra.mxu0 %v1958_v20 }
  0xc0   : > { %1940 = vmatmul.mubr.msk.f32.vlgmr.msra.gmra.mrb[2].mxu0 %vm631_vm1, %v619_v16 }
 0x18a   : > { %v975_v22 = vpop.f32.mrb[0].mxu1 }
 0x18b   : > { %v976_v24 = vadd.f32 %v1872_v21, %v975_v22  ;;  %v1930_v25 = vpop.f32.mrb[1].mxu1  ;;  %v701_v26 = vpop.f32.mrb[0].mxu0 }
 0x18c   : > { %v1919_v27 = vpop.f32.mrb[1].mxu0  ;;  %v702_v28 = vadd.f32 %v1868_v23, %v701_v26 }
 0x18d   : > { %986 = vrot.lane.b32.xlu1 %v976_v24, %s2391_s18  ;;  %980 = vrot.lane.b32.xlu0 %v976_v24, %s2392_s9 }
 0x191   : > { %983 = vrot.lane.b32.xlu0 %v976_v24, %s2393_s21  ;;  %706 = vrot.lane.b32.xlu1 %v702_v28, %s2392_s9 }
 0x193   : > { %v2740_v29 = vpop.f32.mrb[2].mxu0 }
 0x194   : > { %v1941_v30 = vpop.f32.mrb[3].mxu0 }
 0x195   : > { %709 = vrot.lane.b32.xlu0 %v702_v28, %s2393_s21  ;;  %712 = vrot.lane.b32.xlu1 %v702_v28, %s2391_s18 }
 0x1ff   : > { %v987_v38 = vpop.permute.xlu1 %986  ;;  %v981_v39 = vpop.permute.xlu0 %980 }
 0x200   : > { %v1005_v42 = vcombine.low %v981_v39, %v987_v38  ;;  %v1006_v43 = vcombine.high %v981_v39, %v987_v38 }
 0x202   : > { %v1013_v49 = vrot.slane %v1005_v42, %v2742_v41  ;;  %v1020_v50 = vrot.slane %v1006_v43, %v2742_v41 }
 0x203   : > { %v984_v44 = vpop.permute.xlu0 %983  ;;  %v707_v45 = vpop.permute.xlu1 %706 }
 0x204   : > { %v989_v46 = vcombine.low %v976_v24, %v984_v44  ;;  %v990_v47 = vcombine.high %v976_v24, %v984_v44 }
 0x206   : > { %v997_v51 = vrot.slane %v989_v46, %v2742_v41  ;;  %v1004_v52 = vrot.slane %v990_v47, %v2742_v41 }
 0x207   : > { %v710_v53 = vpop.permute.xlu0 %709  ;;  %v713_v54 = vpop.permute.xlu1 %712 }
 0x208   : > { %v1021_v55 = vcombine.low %v997_v51, %v1013_v49  ;;  %v1022_v56 = vcombine.high %v997_v51, %v1013_v49  ;;  %v1037_v57 = vcombine.low %v1004_v52, %v1020_v50  ;;  %v1038_v58 = vcombine.high %v1004_v52, %v1020_v50 }
 0x209   : > { %v715_v59 = vcombine.low %v702_v28, %v710_v53  ;;  %v716_v60 = vcombine.high %v702_v28, %v710_v53  ;;  %v731_v61 = vcombine.low %v707_v45, %v713_v54  ;;  %v732_v62 = vcombine.high %v707_v45, %v713_v54  ;;  %v1876_v45 = vld [vmem:[#allocation10] ss:$0 sm:$0xff] }
 0x20a   : > { %v1029_v63 = vrot.slane %v1021_v55, %v2744_v48  ;;  %v1036_v0 = vrot.slane %v1022_v56, %v2744_v48  ;;  %v1045_v1 = vrot.slane %v1037_v57, %v2744_v48  ;;  %v1052_v2 = vrot.slane %v1038_v58, %v2744_v48 }
 0x20b   : > { %v723_v3 = vrot.slane %v715_v59, %v2742_v41  ;;  %v730_v4 = vrot.slane %v716_v60, %v2742_v41  ;;  %v739_v5 = vrot.slane %v731_v61, %v2742_v41  ;;  %v746_v6 = vrot.slane %v732_v62, %v2742_v41 }
 0x20c   : > { %v1057_v7 = vcombine.low %v1029_v63, %v1036_v0  ;;  %v1874_v8 = vcombine.high %v1029_v63, %v1036_v0  ;;  %v1073_v9 = vcombine.low %v1045_v1, %v1052_v2  ;;  %v1875_v10 = vcombine.high %v1045_v1, %v1052_v2  ;;  %v1126_v63 = vld [vmem:[%s3025_s10] sm:$0xff] }
 0x20d   : > { %v747_v15 = vcombine.low %v723_v3, %v739_v5  ;;  %v748_v16 = vcombine.high %v723_v3, %v739_v5  ;;  %v763_v17 = vcombine.low %v730_v4, %v746_v6  ;;  %v764_v18 = vcombine.high %v730_v4, %v746_v6  ;;  %v1125_v0 = vld [vmem:[%s3067_s15] sm:$0xff] }
 0x20e   : > { %v1064_v11 = vrot.slane %v1057_v7, %v2742_v41  ;;  %v1072_v12 = vrot.slane %v1874_v8, %v2742_v41  ;;  %v1080_v13 = vrot.slane %v1073_v9, %v2742_v41  ;;  %v1088_v14 = vrot.slane %v1875_v10, %v2742_v41 }
 0x20f   : > { %v755_v25 = vrot.slane %v747_v15, %v2744_v48  ;;  %v762_v26 = vrot.slane %v748_v16, %v2744_v48  ;;  %v771_v27 = vrot.slane %v763_v17, %v2744_v48  ;;  %v778_v28 = vrot.slane %v764_v18, %v2744_v48 }
 0x210   : > { %v1089_v19 = vcombine.low %v1064_v11, %v1072_v12  ;;  %v1105_v20 = vcombine.low %v1080_v13, %v1088_v14  ;;  %v1090_v21 = vcombine.high %v1064_v11, %v1072_v12  ;;  %v1106_v22 = vcombine.high %v1080_v13, %v1088_v14 }
 0x211   : > { %v783_v34 = vcombine.low %v755_v25, %v762_v26  ;;  %v1870_v35 = vcombine.high %v755_v25, %v762_v26  ;;  %v799_v36 = vcombine.low %v771_v27, %v778_v28  ;;  %v1871_v37 = vcombine.high %v771_v27, %v778_v28 }
 0x212   : > { %v1097_v23 = vrot.slane %v1089_v19, %v2744_v48  ;;  %v1113_v24 = vrot.slane %v1105_v20, %v2744_v48  ;;  %v1104_v32 = vrot.slane %v1090_v21, %v2744_v48  ;;  %v1120_v33 = vrot.slane %v1106_v22, %v2744_v48 }
 0x213   : > { %v790_v40 = vrot.slane %v783_v34, %v2742_v41  ;;  %v798_v42 = vrot.slane %v1870_v35, %v2742_v41  ;;  %v806_v43 = vrot.slane %v799_v36, %v2742_v41  ;;  %v814_v44 = vrot.slane %v1871_v37, %v2742_v41 }
 0x214   : > { %v1121_v30 = vcombine.low %v1097_v23, %v1113_v24  ;;  %v1122_v31 = vcombine.high %v1097_v23, %v1113_v24  ;;  %v1123_v38 = vcombine.low %v1104_v32, %v1120_v33  ;;  %v2772_v39 = vcombine.high %v1104_v32, %v1120_v33 }
 0x215   : > { %v815_v46 = vcombine.low %v790_v40, %v798_v42  ;;  %v831_v47 = vcombine.low %v806_v43, %v814_v44  ;;  %v2783_v49 = vadd.f32 %v1876_v45, %v2740_v29  ;;  %v816_v52 = vcombine.high %v790_v40, %v798_v42 }
 0x216   : > { %1135 = vrot.lane.b32.xlu0 %v1121_v30, %s2396_s20  ;;  %1137 = vrot.lane.b32.xlu1 %v1122_v31, %s2396_s20  ;;  %v832_v53 = vcombine.high %v806_v43, %v814_v44  ;;  %v1127_v7 = vmul.f32 %v1125_v0, %v1121_v30  ;;  %v1128_v8 = vmul.f32 %v1125_v0, %v1122_v31 }
 0x217   : > { %v823_v50 = vrot.slane %v815_v46, %v2744_v48  ;;  %v839_v51 = vrot.slane %v831_v47, %v2744_v48  ;;  %v830_v55 = vrot.slane %v816_v52, %v2744_v48  ;;  %v1129_v16 = vmul.f32 %v1125_v0, %v1123_v38  ;;  %v851_v52 = vld [vmem:[%s3068_s23] sm:$0xff]  ;;  %s3072_s23 = smov %s3071_s28 }
 0x218   : > { %v846_v56 = vrot.slane %v832_v53, %v2744_v48  ;;  %v1130_v21 = vmul.f32 %v1125_v0, %v2772_v39 }
 0x219   : > { %v2791_v54 = vcombine.low %v823_v50, %v839_v51  ;;  %v2801_v57 = vcombine.high %v823_v50, %v839_v51 }
 0x21a   : > { %1139 = vrot.lane.b32.xlu0 %v1123_v38, %s2396_s20  ;;  %1141 = vrot.lane.b32.xlu1 %v2772_v39, %s2396_s20  ;;  %v2799_v29 = vcombine.low %v830_v55, %v846_v56  ;;  %v2807_v58 = vcombine.high %v830_v55, %v846_v56 }
 0x21e   : > { %1147 = vrot.lane.b32.xlu0 %v1121_v30, %s2397_s12  ;;  %1149 = vrot.lane.b32.xlu1 %v1122_v31, %s2397_s12 }
 0x222   : > { %1151 = vrot.lane.b32.xlu0 %v1123_v38, %s2397_s12  ;;  %1153 = vrot.lane.b32.xlu1 %v2772_v39, %s2397_s12 }
 0x226   : > { %1256 = vrot.lane.b32.xlu1 %v2783_v49, %s2393_s21  ;;  %1253 = vrot.lane.b32.xlu0 %v2783_v49, %s2392_s9  ;;  %s3069_s21 = sld [smem:[#allocation25_spill]]  ;;  %s1540_s9 = scalar_lea.sflag [#allocation4], %s2706_s1 }
 0x22a   : > { %861 = vrot.lane.b32.xlu1 %v2791_v54, %s2396_s20  ;;  %1259 = vrot.lane.b32.xlu0 %v2783_v49, %s2391_s18 }
 0x22c   : > { %v852_v53 = vld [vmem:[%s3069_s21] sm:$0xff] }
 0x22e   : > { %865 = vrot.lane.b32.xlu1 %v2799_v29, %s2396_s20  ;;  %863 = vrot.lane.b32.xlu0 %v2801_v57, %s2396_s20 }
 0x232   : > { %873 = vrot.lane.b32.xlu1 %v2791_v54, %s2397_s12  ;;  %867 = vrot.lane.b32.xlu0 %v2807_v58, %s2396_s20  ;;  %s2844_s20 = sshll.u32 %s2706_s1, 5 }
 0x233   : > { %s588_s17 = scalar_lea.vmem [#allocation11], %s2844_s20  ;;  %s2867_s13 = scalar_lea.vmem [#allocation14], %s2844_s20 }
 0x234   : > { %s1564_s8 = sshll.u32 %s588_s17, 4  ;;  %s2877_s8 = int_to_ptr.vmem [resolvable:$true] %s1564_s8 }
 0x235   : > { %s2229_s21 = scalar_lea.vmem %s2877_s8, 512 }
 0x236   : > { %877 = vrot.lane.b32.xlu1 %v2799_v29, %s2397_s12  ;;  %875 = vrot.lane.b32.xlu0 %v2801_v57, %s2397_s12  ;;  %p2230_p2 = scmp.ne.s32.totalorder %s2877_s8, %s2229_s21 }
 0x238   : > { %p2231_p7 = pnand %p2230_p2, %p3073_p0 }
 0x23a   : > { %879 = vrot.lane.b32.xlu0 %v2807_v58, %s2397_s12  ;;  %s3070_s12 = sld [smem:[#allocation20_spill]]  ;;  %p2232_p5 = pneg %p2231_p7 }
 0x240   : > { %s2863_s22 = sshll.u32 %s3070_s12, 9  ;;  %s2398_s12 = smov [#allocation11]  }
 0x241   : > { %s2885_s18 = scalar_lea.hbm %s3071_s28, %s2863_s22  ;;  %s2233_s0 = sshll.u32 %s2398_s12, 4  ;;  %s2234_s0 = int_to_ptr.vmem [resolvable:$false] %s2233_s0 }
 0x242   : > { %s2235_s2 = scalar_lea.vmem %s2234_s0, 1024  ;;  %p2236_p8 = scmp.lt.s32.totalorder %s2877_s8, %s2234_s0 }
 0x243   : > { %p2237_p3 = scmp.lt.s32.totalorder %s2235_s2, %s2229_s21 }
 0x245   : > { %p2238_p11 = por %p2237_p3, %p2236_p8 }
 0x247   : > { %p2239_p6 = pnand %p2238_p11, %p2232_p5 }
 0x288   : > { %v1136_v59 = vpop.permute.xlu0 %1135  ;;  %v1138_v60 = vpop.permute.xlu1 %1137 }
 0x28c   : > { %v1140_v61 = vpop.permute.xlu0 %1139  ;;  %v1142_v62 = vpop.permute.xlu1 %1141 }
 0x290   : > { %v1148_v1 = vpop.permute.xlu0 %1147  ;;  %v1150_v2 = vpop.permute.xlu1 %1149 }
 0x291   : > { %v1159_v3 = vsel %vm885_vm2, %v1136_v59, %v1148_v1  ;;  %v1160_v4 = vsel %vm885_vm2, %v1138_v60, %v1150_v2 }
 0x292   : > { %v1163_v5 = vmul.f32 %v1159_v3, %v1126_v63  ;;  %v1164_v6 = vmul.f32 %v1160_v4, %v1126_v63 }
 0x294   : > { %v1152_v9 = vpop.permute.xlu0 %1151  ;;  %v1154_v10 = vpop.permute.xlu1 %1153  ;;  %v1167_v11 = vadd.f32 %v1163_v5, %v1127_v7  ;;  %v1168_v12 = vadd.f32 %v1164_v6, %v1128_v8 }
 0x295   : > { %v1161_v13 = vsel %vm885_vm2, %v1140_v61, %v1152_v9  ;;  %v1162_v14 = vsel %vm885_vm2, %v1142_v62, %v1154_v10  ;;  %v853_v62 = vmul.f32 %v851_v52, %v2791_v54 }
 0x296   : > { %v1165_v15 = vmul.f32 %v1161_v13, %v1126_v63  ;;  %1403 = vxpose.xlu1.b32.start.end [1/1] (short) (narrow) %v1167_v11, 8  ;;  %1435 = vxpose.xlu0.b32.start.end [1/1] (short) (narrow) %v1168_v12, 8  ;;  %v1166_v17 = vmul.f32 %v1162_v14, %v1126_v63  ;;  %v855_v11 = vmul.f32 %v851_v52, %v2799_v29 }
 0x297   : > { %v854_v13 = vmul.f32 %v851_v52, %v2801_v57  ;;  %v856_v29 = vmul.f32 %v851_v52, %v2807_v58 }
 0x298   : > { %v1257_v18 = vpop.permute.xlu1 %1256  ;;  %v1254_v19 = vpop.permute.xlu0 %1253  ;;  %v1169_v20 = vadd.f32 %v1165_v15, %v1129_v16  ;;  %v1170_v26 = vadd.f32 %v1166_v17, %v1130_v21 }
 0x299   : > { %v1262_v22 = vcombine.low %v2783_v49, %v1257_v18  ;;  %v1263_v23 = vcombine.high %v2783_v49, %v1257_v18 }
 0x29a   : > { %1467 = vxpose.xlu0.b32.start.end [1/1] (short) (narrow) %v1169_v20, 8 }
 0x29b   : > { %v1270_v30 = vrot.slane %v1262_v22, %v2742_v41  ;;  %v1277_v31 = vrot.slane %v1263_v23, %v2742_v41 }
 0x29c   : > { %v862_v24 = vpop.permute.xlu1 %861  ;;  %v1260_v25 = vpop.permute.xlu0 %1259 }
 0x29d   : > { %v1278_v27 = vcombine.low %v1254_v19, %v1260_v25  ;;  %v1279_v28 = vcombine.high %v1254_v19, %v1260_v25 }
 0x29e   : > { %1499 = vxpose.xlu0.b32.start.end [1/1] (short) (narrow) %v1170_v26, 8 }
 0x29f   : > { %v1286_v32 = vrot.slane %v1278_v27, %v2742_v41  ;;  %v1293_v33 = vrot.slane %v1279_v28, %v2742_v41 }
 0x2a0   : > { %v866_v34 = vpop.permute.xlu1 %865  ;;  %v864_v35 = vpop.permute.xlu0 %863 }
 0x2a1   : > { %v1294_v36 = vcombine.low %v1270_v30, %v1286_v32  ;;  %v1295_v37 = vcombine.high %v1270_v30, %v1286_v32  ;;  %v1310_v38 = vcombine.low %v1277_v31, %v1293_v33  ;;  %v1311_v39 = vcombine.high %v1277_v31, %v1293_v33 }
 0x2a3   : > { %v1302_v40 = vrot.slane %v1294_v36, %v2744_v48  ;;  %v1309_v42 = vrot.slane %v1295_v37, %v2744_v48  ;;  %v1318_v43 = vrot.slane %v1310_v38, %v2744_v48  ;;  %v1325_v44 = vrot.slane %v1311_v39, %v2744_v48 }
 0x2a4   : > { %v874_v45 = vpop.permute.xlu1 %873  ;;  %v868_v46 = vpop.permute.xlu0 %867 }
 0x2a5   : > { %v1330_v47 = vcombine.low %v1302_v40, %v1309_v42  ;;  %v1878_v49 = vcombine.high %v1302_v40, %v1309_v42  ;;  %v1346_v50 = vcombine.low %v1318_v43, %v1325_v44  ;;  %v1879_v51 = vcombine.high %v1318_v43, %v1325_v44 }
 0x2a6   : > { %v886_v55 = vsel %vm885_vm2, %v862_v24, %v874_v45 }
 0x2a7   : > { %v1337_v56 = vrot.slane %v1330_v47, %v2742_v41  ;;  %v1345_v59 = vrot.slane %v1878_v49, %v2742_v41  ;;  %v1353_v60 = vrot.slane %v1346_v50, %v2742_v41  ;;  %v1361_v61 = vrot.slane %v1879_v51, %v2742_v41 }
 0x2a8   : > { %v890_v63 = vmul.f32 %v886_v55, %v852_v53  ;;  %v878_v0 = vpop.permute.xlu1 %877  ;;  %v876_v1 = vpop.permute.xlu0 %875 }
 0x2a9   : > { %v1362_v2 = vcombine.low %v1337_v56, %v1345_v59  ;;  %v1363_v3 = vcombine.high %v1337_v56, %v1345_v59  ;;  %v1378_v4 = vcombine.low %v1353_v60, %v1361_v61  ;;  %v1379_v5 = vcombine.high %v1353_v60, %v1361_v61 }
 0x2aa   : > { %v894_v6 = vadd.f32 %v890_v63, %v853_v62  ;;  %v888_v7 = vsel %vm885_vm2, %v866_v34, %v878_v0  ;;  %v887_v8 = vsel %vm885_vm2, %v864_v35, %v876_v1 }
 0x2ab   : > { %v1370_v9 = vrot.slane %v1362_v2, %v2744_v48  ;;  %v1377_v41 = vrot.slane %v1363_v3, %v2744_v48  ;;  %v1386_v54 = vrot.slane %v1378_v4, %v2744_v48  ;;  %v1393_v10 = vrot.slane %v1379_v5, %v2744_v48 }
 0x2ac   : > { %v892_v12 = vmul.f32 %v888_v7, %v852_v53  ;;  %v891_v14 = vmul.f32 %v887_v8, %v852_v53  ;;  %v880_v15 = vpop.permute.xlu0 %879  ;;  %1399 = vst.msk [vmem:[%s588_s17] sm:$0xff] %vm1398_vm3, %v894_v6 }
 0x2ad   : > { %v1394_v16 = vcombine.low %v1370_v9, %v1386_v54  ;;  %v1395_v17 = vcombine.high %v1370_v9, %v1386_v54  ;;  %v1396_v18 = vcombine.low %v1377_v41, %v1393_v10  ;;  %v1397_v19 = vcombine.high %v1377_v41, %v1393_v10 }
 0x2ae   : > { %v896_v20 = vadd.f32 %v892_v12, %v855_v11  ;;  %v895_v21 = vadd.f32 %v891_v14, %v854_v13  ;;  %v889_v48 = vsel %vm885_vm2, %v868_v46, %v880_v15 }
 0x2af   : > { %v893_v57 = vmul.f32 %v889_v48, %v852_v53  ;;  %1535 = vst.msk [vmem:[%s2867_s13] sm:$0xff] %vm1398_vm3, %v1394_v16  ;;  %1536 = vst.msk [vmem:[%s2867_s13 + $0x8] sm:$0xff] %vm1398_vm3, %v1395_v17 }
 0x2b0   : > { %1537 = vst.msk [vmem:[%s2867_s13 + $0x10] sm:$0xff] %vm1398_vm3, %v1396_v18  ;;  %1538 = vst.msk [vmem:[%s2867_s13 + $0x18] sm:$0xff] %vm1398_vm3, %v1397_v19 }
 0x2b1   : > { %1400 = vst.msk [vmem:[%s588_s17 + $0x8] sm:$0xff] %vm1398_vm3, %v895_v21  ;;  %1401 = vst.msk [vmem:[%s588_s17 + $0x10] sm:$0xff] %vm1398_vm3, %v896_v20  ;;  %v897_v58 = vadd.f32 %v893_v57, %v856_v29 }
 0x2b3   : > { %1402 = vst.msk [vmem:[%s588_s17 + $0x18] sm:$0xff] %vm1398_vm3, %v897_v58 }
 0x2b4   : > { %2242 = shalt.err (!%p2239_p6)
}
 0x2b5   : > { %s2243_s17 = scalar_lea.hbm %s2885_s18, 512  ;;  %s2247_s28 = scalar_lea.hbm %s3072_s23, 1024 }
 0x2b6   : > { %p2244_p13 = scmp.ne.s32.totalorder %s2885_s18, %s2243_s17  ;;  %p2248_p9 = scmp.lt.u32.totalorder %s2885_s18, %s3072_s23 }
 0x2b7   : > { %p2249_p10 = scmp.lt.u32.totalorder %s2247_s28, %s2243_s17  ;;  %p2251_p2 = scmp.lt.u32.totalorder %s2243_s17, %s2885_s18 }
 0x2b8   : > { %p2245_p12 = pnand %p2244_p13, %p3073_p0 }
 0x2b9   : > { %p2250_p1 = por %p2249_p10, %p2248_p9 }
 0x2ba   : > { %p2246_p4 = pneg %p2245_p12 }
 0x2bb   : > { %p2252_p7 = por %p2251_p2, %p2250_p1 }
 0x2bd   : > { %p2253_p5 = pnand %p2252_p7, %p2246_p4 }
 0x2bf   : > { %2256 = shalt.err (!%p2253_p5)
}
 0x2c0   : > { %s3036_s2 = smov 128   ;;  %s3038_s21 = smov 8  }
 0x2c1   : > { %1978 = dma.vmem_to_hbm [thread:$0]  (%p3073_p0), %s2877_s8, 512, %s2885_s18, %s1540_s9, %s3036_s2, %s3036_s2, %s3038_s21  }
 0x2c2   : > { %s595_s17 = scalar_lea.vmem [#allocation12], %s2844_s20  ;;  %s1544_s11 = sand.u32 1, %s2504_s14  }
 0x2c3   : > { %s1581_s15 = sshll.u32 %s595_s17, 4  ;;  %s1598_s28 = sshll.u32 %s2867_s13, 4  ;;  %s2921_s15 = int_to_ptr.vmem [resolvable:$true] %s1581_s15  ;;  %s2929_s28 = int_to_ptr.vmem [resolvable:$true] %s1598_s28 }
 0x2c4   : > { %s3074_s0 = sld [smem:[#allocation28_spill]]  ;;  %s3075_s9 = sld [smem:[#allocation29_spill]] }
 0x2c5   : > { %s2938_s13 = scalar_lea.sflag [#allocation13], %s1544_s11  ;;  %s2257_s2 = scalar_lea.vmem %s2921_s15, 512 }
 0x2c6   : > { %p2258_p8 = scmp.ne.s32.totalorder %s2921_s15, %s2257_s2  ;;  %s2401_s12 = smov [#allocation12]  }
 0x2c7   : > { %s2261_s1 = sshll.u32 %s2401_s12, 4  ;;  %s2262_s1 = int_to_ptr.vmem [resolvable:$false] %s2261_s1 }
 0x2c8   : > { %p2259_p3 = pnand %p2258_p8, %p3073_p0  ;;  %s2263_s21 = scalar_lea.vmem %s2262_s1, 1024 }
 0x2c9   : > { %p2264_p6 = scmp.lt.s32.totalorder %s2921_s15, %s2262_s1  ;;  %p2265_p13 = scmp.lt.s32.totalorder %s2263_s21, %s2257_s2 }
 0x2ca   : > { %s2927_s20 = scalar_lea.hbm %s3074_s0, %s2863_s22  ;;  %s2935_s14 = scalar_lea.hbm %s3075_s9, %s2863_s22 }
 0x2cb   : > { %p2260_p11 = pneg %p2259_p3  ;;  %p2266_p12 = por %p2265_p13, %p2264_p6 }
 0x2cd   : > { %p2267_p4 = pnand %p2266_p12, %p2260_p11 }
 0x316   : > { %v1451_v22 = vpop.trf.xlu0  ;;  %v1419_v23 = vpop.trf.xlu1 }
 0x317   : > { %1532 = vst.msk [vmem:[%s595_s17 + $0x8] sm:$0xff] %vm1398_vm3, %v1451_v22  ;;  %1531 = vst.msk [vmem:[%s595_s17] sm:$0xff] %vm1398_vm3, %v1419_v23 }
 0x31a   : > { %v1483_v24 = vpop.trf.xlu0 }
 0x31b   : > { %1533 = vst.msk [vmem:[%s595_s17 + $0x10] sm:$0xff] %vm1398_vm3, %v1483_v24 }
 0x31e   : > { %v1515_v25 = vpop.trf.xlu0 }
 0x31f   : > { %1534 = vst.msk [vmem:[%s595_s17 + $0x18] sm:$0xff] %vm1398_vm3, %v1515_v25 }
 0x320   : > { %2270 = shalt.err (!%p2267_p4)
}
 0x321   : > { %s2271_s22 = scalar_lea.hbm %s2927_s20, 512  ;;  %s2275_s8 = scalar_lea.hbm %s3074_s0, 1024 }
 0x322   : > { %p2272_p9 = scmp.ne.s32.totalorder %s2927_s20, %s2271_s22  ;;  %p2276_p2 = scmp.lt.u32.totalorder %s2927_s20, %s3074_s0 }
 0x323   : > { %p2277_p7 = scmp.lt.u32.totalorder %s2275_s8, %s2271_s22  ;;  %p2279_p8 = scmp.lt.u32.totalorder %s2271_s22, %s2927_s20 }
 0x324   : > { %p2273_p10 = pnand %p2272_p9, %p3073_p0 }
 0x325   : > { %p2278_p5 = por %p2277_p7, %p2276_p2 }
 0x326   : > { %p2274_p1 = pneg %p2273_p10 }
 0x327   : > { %p2280_p3 = por %p2279_p8, %p2278_p5 }
 0x329   : > { %p2281_p11 = pnand %p2280_p3, %p2274_p1 }
 0x32b   : > { %2284 = shalt.err (!%p2281_p11)
}
 0x32c   : > { %s3076_s2 = smov 8   ;;  %s3077_s21 = smov 128  }
 0x32d   : > { %1979 = dma.vmem_to_hbm [thread:$0]  (%p3073_p0), %s2921_s15, 512, %s2927_s20, %s2938_s13, %s3077_s21, %s3077_s21, %s3076_s2  }
 0x32e   : > { %s2285_s1 = scalar_lea.vmem %s2929_s28, 512  ;;  %s2402_s22 = smov [#allocation14]  }
 0x32f   : > { %p2286_p6 = scmp.ne.s32.totalorder %s2929_s28, %s2285_s1  ;;  %s2289_s17 = sshll.u32 %s2402_s22, 4  ;;  %s2290_s17 = int_to_ptr.vmem [resolvable:$false] %s2289_s17 }
 0x330   : > { %s2291_s11 = scalar_lea.vmem %s2290_s17, 1024  ;;  %p2292_p4 = scmp.lt.s32.totalorder %s2929_s28, %s2290_s17 }
 0x331   : > { %p2287_p13 = pnand %p2286_p6, %p3073_p0  ;;  %p2293_p9 = scmp.lt.s32.totalorder %s2291_s11, %s2285_s1 }
 0x333   : > { %p2288_p12 = pneg %p2287_p13  ;;  %p2294_p10 = por %p2293_p9, %p2292_p4 }
 0x335   : > { %p2295_p1 = pnand %p2294_p10, %p2288_p12 }
 0x337   : > { %2298 = shalt.err (!%p2295_p1)
}
 0x338   : > { %s2299_s15 = scalar_lea.hbm %s2935_s14, 512  ;;  %s2303_s18 = scalar_lea.hbm %s3075_s9, 1024 }
 0x339   : > { %p2300_p2 = scmp.ne.s32.totalorder %s2935_s14, %s2299_s15  ;;  %p2304_p8 = scmp.lt.u32.totalorder %s2935_s14, %s3075_s9 }
 0x33a   : > { %p2305_p3 = scmp.lt.u32.totalorder %s2303_s18, %s2299_s15  ;;  %p2307_p6 = scmp.lt.u32.totalorder %s2299_s15, %s2935_s14 }
 0x33b   : > { %p2301_p7 = pnand %p2300_p2, %p3073_p0 }
 0x33c   : > { %p2306_p11 = por %p2305_p3, %p2304_p8 }
 0x33d   : > { %p2302_p5 = pneg %p2301_p7 }
 0x33e   : > { %p2308_p13 = por %p2307_p6, %p2306_p11 }
 0x340   : > { %p2309_p12 = pnand %p2308_p13, %p2302_p5 }
 0x342   : > { %2312 = shalt.err (!%p2309_p12)
}
 0x343   : > { %1980 = dma.vmem_to_hbm [thread:$0]  (%p3073_p0), %s2929_s28, 512, %s2935_s14, %s2938_s13, %s3077_s21, %s3077_s21, %s3076_s2  }
 0x344 PF: > { %s1613_s1 = sand.u32 1, %s2359_s25   ;;  %p3078_p4 = scmp.ne.s32.totalorder %s3058_s19, 0 }
 0x345   : > { %p3079_p9 = scmp.ge.s32.totalorder %s2379_s30, 2  ;;  %s1614_s17 = scalar_lea.sflag [#allocation4], %s1613_s1 }
 0x347   : > { %p2002_p10 = pnand %p3079_p9, %p3078_p4 }
 0x349   : > { %2350 = dma.done.wait (!%p2002_p10), %s1614_s17, 512  }
 0x34a   : > { %2352 = vsyncadd (!%p2002_p10), %s1614_s17, 4294966784  ;;  %s3080_s24 = sadd.s32 4294967294, %s2379_s30  }
 0x34b   : > { %s1622_s11 = sand.u32 1, %s3080_s24  }
 0x34c   : > { %s1623_s15 = scalar_lea.sflag [#allocation13], %s1622_s11 }
 0x34d   : > { %2354 = dma.done.wait (!%p2002_p10), %s1623_s15, 1024  }
 0x34e   : > { %2356 = vsyncadd (!%p2002_p10), %s1623_s15, 4294966272  ;;  %s35_s30 = sadd.s32 1, %s2379_s30   ;;  %s3081_s25 = smov %s2363_s26 }
 0x34f   : > { %p32_p0 = scmp.ge.s32.totalorder %s35_s30, 4   ;;  %s3082_s26 = smov %s2367_s27 }
 0x350   : > { %s3083_s27 = smov %s2656_s16  ;;  %s3084_s28 = smov %s2375_s29 }
 0x351   : > { %s3085_s29 = smov %s3087_s7  ;;  %34 = sbr.rel (!%p32_p0) target bundleno = 20 (0x14), region = 169 }
 0x358   :  { %1637 = vsyncpa [#allocation3], 1 }
 0x359   :  { %1639 = vsyncpa [#allocation3 + $0x1], 1 }
 0x35a   :  { %1640 = vsyncpa [#allocation6], 1 }
 0x35b   :  { %1641 = vsyncpa [#allocation9], 1 }
 0x35c   :  { %1642 = vsyncpa [#allocation4], 1 }
 0x35d   :  { %1644 = vsyncpa [#allocation4 + $0x1], 1 }
 0x35e   :  { %1645 = vsyncpa [#allocation13], 1 }
 0x35f   :  { %1647 = vsyncpa [#allocation13 + $0x1], 1 }

</bundles_post_ra>
